<compile_context>
chip_gen: v7x
topology: tpu7x:2x2x1
jax: 0.10.0
libtpu: 0.0.40
codegen_flags: <defaults>
</compile_context>

<pallas_src>
import functools

import jax
import jax.numpy as jnp
from jax.experimental import pallas as pl
from jax.experimental.pallas import tpu as pltpu


BN_EPS = 0.001
LEAKY_SLOPE = 0.1
LANE = 128
SUBLANE = 8


def layer_width_function(layer: int, layers: int, inp: int, out: int):
    layer_in = int(inp * (layers - layer) / layers + out * layer / layers)
    layer_out = int(inp * (layers - layer - 1) / layers + out * (layer + 1) / layers)
    return (layer_in, layer_out)


def simplenet_layer_dims(input_size, output_size, downsample_steps, extra_steps):
    dims = []
    li, lo = layer_width_function(0, downsample_steps, input_size, input_size)
    dims.append((li, lo))
    for i in range(downsample_steps):
        li, lo = layer_width_function(i, downsample_steps, input_size, output_size)
        dims.append((li, lo))
        if i == 0:
            for _ in range(extra_steps):
                dims.append((lo, lo))
    return tuple(dims)


def init_simplenet_params(key, dims):
    """Mirror PyTorch defaults: Linear ~ U(-1/sqrt(fan_in), +), BN gamma=1, beta=0."""
    params = []
    for (fi, fo) in dims:
        key, k_w, k_b = jax.random.split(key, 3)
        bound = 1.0 / (fi ** 0.5)
        w = jax.random.uniform(k_w, (fi, fo), jnp.float32, -bound, bound)
        b = jax.random.uniform(k_b, (fo,), jnp.float32, -bound, bound)
        gamma = jnp.ones((fo,), jnp.float32)
        beta = jnp.zeros((fo,), jnp.float32)
        params.append((w, b, gamma, beta))
    return params


def round_up(x, m):
    return ((x + m - 1) // m) * m


def pack_params(params, kpad, fpad):
    """One contiguous f32 parameter slab (L, round_up(kpad+3, 8), fpad):

       slab[l, :fi,      :fo] = W_l   (contraction rows; rows fi..kpad-1 are zero)
       slab[l, kpad,     :fo] = b_l
       slab[l, kpad + 1, :fo] = gamma_l
       slab[l, kpad + 2, :fo] = beta_l

    Everything else stays exactly zero.  b and beta MUST remain zero in padded lanes so
    padded feature columns stay zero through Linear/LeakyReLU/BatchNorm of every layer
    (gamma padding is harmless); that invariant is what makes the in-kernel lane slices safe.
    """
    L = len(params)
    srows = round_up(kpad + 3, SUBLANE)
    slab = jnp.zeros((L, srows, fpad), jnp.float32)
    for l, (w, b, g, bt) in enumerate(params):
        fi, fo = w.shape
        assert fi <= kpad and fo <= fpad, (fi, fo, kpad, fpad)
        slab = slab.at[l, :fi, :fo].set(w)
        slab = slab.at[l, kpad, :fo].set(b)
        slab = slab.at[l, kpad + 1, :fo].set(g)
        slab = slab.at[l, kpad + 2, :fo].set(bt)
    return slab


def fused_simplenet_kernel(x_ref, slab_ref, o_ref, *, num_layers, batch, kpad, out_features):
    """Whole SimpleNet stack in one VMEM-resident kernel.

    x_ref    : (B, kpad)                      activations (kpad multiple of 8)
    slab_ref : (L, kpad+pad, Fpad)            weights + bias/gamma/beta rows, lane-dense
    o_ref    : (B, out_features)
    """
    inv_b = 1.0 / float(batch)
    y = x_ref[...]                                        # (B, kpad)
    for l in range(num_layers):                           # static unroll; L is tiny
        slab = slab_ref[l]                                # one (kpad+pad, Fpad) load per layer
        w = slab[:kpad]                                   # (kpad, Fpad)
        b = slab[kpad:kpad + 1]                           # (1, Fpad)
        g = slab[kpad + 1:kpad + 2]                       # (1, Fpad)
        bt = slab[kpad + 2:kpad + 3]                      # (1, Fpad)
        # Linear (MXU, f32 accumulate)
        y = jnp.dot(y, w, preferred_element_type=jnp.float32) + b
        # LeakyReLU(0.1)
        y = jnp.where(y >= 0, y, LEAKY_SLOPE * y)
        # BatchNorm1d, training mode, biased variance — one reduction pass (XLU) + EUP rsqrt.
        s = jnp.sum(y, axis=0, keepdims=True)             # (1, Fpad)
        ss = jnp.sum(y * y, axis=0, keepdims=True)        # (1, Fpad)
        mean = s * inv_b
        var = jnp.maximum(ss * inv_b - mean * mean, 0.0)  # clamp one-pass cancellation
        y = (y - mean) * (jax.lax.rsqrt(var + BN_EPS) * g) + bt
        if l + 1 < num_layers:
            y = y[:, :kpad]                               # next layer contracts kpad lanes only
    o_ref[...] = y[:, :out_features].astype(o_ref.dtype)


@functools.partial(jax.jit, static_argnames=("dims", "out_features", "kpad", "fpad"))
def simplenet_forward(x, slab, *, dims, out_features, kpad, fpad):
    B, fin = x.shape
    L = len(dims)
    if fin < kpad:                                        # no-op for the default config
        x = jnp.pad(x, ((0, 0), (0, kpad - fin)))

    flops = sum(2 * B * fi * fo for (fi, fo) in dims)
    transcendentals = sum(fo for (_, fo) in dims)         # one rsqrt lane per feature/layer
    bytes_accessed = 4 * (B * kpad + slab.size + B * out_features)

    vmem = pl.BlockSpec(memory_space=pltpu.MemorySpace.VMEM)
    return pl.pallas_call(
        functools.partial(fused_simplenet_kernel, num_layers=L, batch=B,
                          kpad=kpad, out_features=out_features),
        out_shape=jax.ShapeDtypeStruct((B, out_features), x.dtype),
        in_specs=[vmem, vmem],
        out_specs=vmem,
        cost_estimate=pl.CostEstimate(flops=flops,
                                      transcendentals=transcendentals,
                                      bytes_accessed=bytes_accessed),
    )(x, slab)


def simplenet_reference(x, params):
    """Pure-JAX reference (unpadded) for correctness checking."""
    y = x
    for (w, b, g, bt) in params:
        y = y @ w + b
        y = jnp.where(y >= 0, y, LEAKY_SLOPE * y)
        mean = jnp.mean(y, axis=0, keepdims=True)
        var = jnp.mean((y - mean) ** 2, axis=0, keepdims=True)
        y = (y - mean) * jax.lax.rsqrt(var + BN_EPS) * g + bt
    return y


if __name__ == "__main__":
    # SimpleNet(input_size=32, output_size=8, downsample_steps=2, extra_steps=1)
    # -> blocks: 32->32, 32->20, 20->20, 20->8
    input_size, output_size = 32, 8
    downsample_steps, extra_steps = 2, 1
    batch = 16

    dims = simplenet_layer_dims(input_size, output_size, downsample_steps, extra_steps)
    kpad = round_up(max(fi for (fi, _) in dims), SUBLANE)              # 32 here
    fpad = round_up(max(max(fi, fo) for (fi, fo) in dims), LANE)       # 128 here

    key = jax.random.PRNGKey(0)
    key, k_x = jax.random.split(key)
    x = jax.random.normal(k_x, (batch, input_size), jnp.float32)

    params = init_simplenet_params(key, dims)
    slab = pack_params(params, kpad, fpad)

    out = simplenet_forward(x, slab, dims=dims, out_features=output_size,
                            kpad=kpad, fpad=fpad)
    jax.block_until_ready(out)
    assert out.shape == (batch, output_size), out.shape

    ref = simplenet_reference(x, params)
    assert jnp.allclose(out, ref, atol=1e-4, rtol=1e-4), float(jnp.max(jnp.abs(out - ref)))

    print("KERNEL_OK")
</pallas_src>

<mosaic_0001>
module attributes {stable_mosaic.version = 11 : i64} {
  func.func @fused_simplenet_kernel(%arg0: memref<16x32xf32, #tpu.memory_space<vmem>>, %arg1: memref<4x40x128xf32, #tpu.memory_space<vmem>>, %arg2: memref<16x8xf32, #tpu.memory_space<vmem>>) attributes {dimension_semantics = [], scalar_prefetch = 0 : i64, scratch_operands = 0 : i64, tpu.core_type = #tpu.core_type<tc>} {
    %c0 = arith.constant 0 : index
    %c0_0 = arith.constant 0 : index
    %0 = vector.load %arg0[%c0, %c0_0] : memref<16x32xf32, #tpu.memory_space<vmem>>, vector<16x32xf32>
    %c0_1 = arith.constant 0 : index
    %c0_2 = arith.constant 0 : index
    %c0_3 = arith.constant 0 : index
    %1 = vector.load %arg1[%c0_1, %c0_2, %c0_3] : memref<4x40x128xf32, #tpu.memory_space<vmem>>, vector<1x40x128xf32>
    %2 = vector.shape_cast %1 : vector<1x40x128xf32> to vector<40x128xf32>
    %3 = vector.extract_strided_slice %2 {offsets = [0, 0], sizes = [32, 128], strides = [1, 1]} : vector<40x128xf32> to vector<32x128xf32>
    %4 = vector.extract_strided_slice %2 {offsets = [32, 0], sizes = [1, 128], strides = [1, 1]} : vector<40x128xf32> to vector<1x128xf32>
    %5 = vector.extract_strided_slice %2 {offsets = [33, 0], sizes = [1, 128], strides = [1, 1]} : vector<40x128xf32> to vector<1x128xf32>
    %6 = vector.extract_strided_slice %2 {offsets = [34, 0], sizes = [1, 128], strides = [1, 1]} : vector<40x128xf32> to vector<1x128xf32>
    %cst = arith.constant dense<0.000000e+00> : vector<16x128xf32>
    %7 = tpu.matmul %0, %3, %cst {dimension_numbers = #tpu.dot_dimension_numbers<[1], [0], [0], [1], [0, 0, 1, 1], [], []>} : vector<16x32xf32>, vector<32x128xf32>, vector<16x128xf32> -> vector<16x128xf32>
    %8 = vector.broadcast %4 : vector<1x128xf32> to vector<16x128xf32>
    %9 = arith.addf %7, %8 : vector<16x128xf32>
    %cst_4 = arith.constant 0.000000e+00 : f32
    %10 = vector.broadcast %cst_4 : f32 to vector<16x128xf32>
    %11 = arith.cmpf oge, %9, %10 : vector<16x128xf32>
    %cst_5 = arith.constant 1.000000e-01 : f32
    %12 = vector.broadcast %cst_5 : f32 to vector<16x128xf32>
    %13 = arith.mulf %12, %9 : vector<16x128xf32>
    %14 = arith.select %11, %9, %13 : vector<16x128xi1>, vector<16x128xf32>
    %cst_6 = arith.constant dense<0.000000e+00> : vector<128xf32>
    %15 = vector.multi_reduction <add>, %14, %cst_6 [0] : vector<16x128xf32> to vector<128xf32>
    %16 = vector.shape_cast %15 : vector<128xf32> to vector<1x128xf32>
    %17 = arith.mulf %14, %14 : vector<16x128xf32>
    %cst_7 = arith.constant dense<0.000000e+00> : vector<128xf32>
    %18 = vector.multi_reduction <add>, %17, %cst_7 [0] : vector<16x128xf32> to vector<128xf32>
    %19 = vector.shape_cast %18 : vector<128xf32> to vector<1x128xf32>
    %cst_8 = arith.constant 6.250000e-02 : f32
    %20 = vector.broadcast %cst_8 : f32 to vector<1x128xf32>
    %21 = arith.mulf %16, %20 : vector<1x128xf32>
    %cst_9 = arith.constant 6.250000e-02 : f32
    %22 = vector.broadcast %cst_9 : f32 to vector<1x128xf32>
    %23 = arith.mulf %19, %22 : vector<1x128xf32>
    %24 = arith.mulf %21, %21 : vector<1x128xf32>
    %25 = arith.subf %23, %24 : vector<1x128xf32>
    %cst_10 = arith.constant 0.000000e+00 : f32
    %26 = vector.broadcast %cst_10 : f32 to vector<1x128xf32>
    %27 = arith.maximumf %25, %26 : vector<1x128xf32>
    %28 = vector.broadcast %21 : vector<1x128xf32> to vector<16x128xf32>
    %29 = arith.subf %14, %28 : vector<16x128xf32>
    %cst_11 = arith.constant 1.000000e-03 : f32
    %30 = vector.broadcast %cst_11 : f32 to vector<1x128xf32>
    %31 = arith.addf %27, %30 : vector<1x128xf32>
    %32 = math.rsqrt %31 : vector<1x128xf32>
    %33 = arith.mulf %32, %5 : vector<1x128xf32>
    %34 = vector.broadcast %33 : vector<1x128xf32> to vector<16x128xf32>
    %35 = arith.mulf %29, %34 : vector<16x128xf32>
    %36 = vector.broadcast %6 : vector<1x128xf32> to vector<16x128xf32>
    %37 = arith.addf %35, %36 : vector<16x128xf32>
    %38 = vector.extract_strided_slice %37 {offsets = [0, 0], sizes = [16, 32], strides = [1, 1]} : vector<16x128xf32> to vector<16x32xf32>
    %c1 = arith.constant 1 : index
    %c0_12 = arith.constant 0 : index
    %c0_13 = arith.constant 0 : index
    %39 = vector.load %arg1[%c1, %c0_12, %c0_13] : memref<4x40x128xf32, #tpu.memory_space<vmem>>, vector<1x40x128xf32>
    %40 = vector.shape_cast %39 : vector<1x40x128xf32> to vector<40x128xf32>
    %41 = vector.extract_strided_slice %40 {offsets = [0, 0], sizes = [32, 128], strides = [1, 1]} : vector<40x128xf32> to vector<32x128xf32>
    %42 = vector.extract_strided_slice %40 {offsets = [32, 0], sizes = [1, 128], strides = [1, 1]} : vector<40x128xf32> to vector<1x128xf32>
    %43 = vector.extract_strided_slice %40 {offsets = [33, 0], sizes = [1, 128], strides = [1, 1]} : vector<40x128xf32> to vector<1x128xf32>
    %44 = vector.extract_strided_slice %40 {offsets = [34, 0], sizes = [1, 128], strides = [1, 1]} : vector<40x128xf32> to vector<1x128xf32>
    %cst_14 = arith.constant dense<0.000000e+00> : vector<16x128xf32>
    %45 = tpu.matmul %38, %41, %cst_14 {dimension_numbers = #tpu.dot_dimension_numbers<[1], [0], [0], [1], [0, 0, 1, 1], [], []>} : vector<16x32xf32>, vector<32x128xf32>, vector<16x128xf32> -> vector<16x128xf32>
    %46 = vector.broadcast %42 : vector<1x128xf32> to vector<16x128xf32>
    %47 = arith.addf %45, %46 : vector<16x128xf32>
    %cst_15 = arith.constant 0.000000e+00 : f32
    %48 = vector.broadcast %cst_15 : f32 to vector<16x128xf32>
    %49 = arith.cmpf oge, %47, %48 : vector<16x128xf32>
    %cst_16 = arith.constant 1.000000e-01 : f32
    %50 = vector.broadcast %cst_16 : f32 to vector<16x128xf32>
    %51 = arith.mulf %50, %47 : vector<16x128xf32>
    %52 = arith.select %49, %47, %51 : vector<16x128xi1>, vector<16x128xf32>
    %cst_17 = arith.constant dense<0.000000e+00> : vector<128xf32>
    %53 = vector.multi_reduction <add>, %52, %cst_17 [0] : vector<16x128xf32> to vector<128xf32>
    %54 = vector.shape_cast %53 : vector<128xf32> to vector<1x128xf32>
    %55 = arith.mulf %52, %52 : vector<16x128xf32>
    %cst_18 = arith.constant dense<0.000000e+00> : vector<128xf32>
    %56 = vector.multi_reduction <add>, %55, %cst_18 [0] : vector<16x128xf32> to vector<128xf32>
    %57 = vector.shape_cast %56 : vector<128xf32> to vector<1x128xf32>
    %cst_19 = arith.constant 6.250000e-02 : f32
    %58 = vector.broadcast %cst_19 : f32 to vector<1x128xf32>
    %59 = arith.mulf %54, %58 : vector<1x128xf32>
    %cst_20 = arith.constant 6.250000e-02 : f32
    %60 = vector.broadcast %cst_20 : f32 to vector<1x128xf32>
    %61 = arith.mulf %57, %60 : vector<1x128xf32>
    %62 = arith.mulf %59, %59 : vector<1x128xf32>
    %63 = arith.subf %61, %62 : vector<1x128xf32>
    %cst_21 = arith.constant 0.000000e+00 : f32
    %64 = vector.broadcast %cst_21 : f32 to vector<1x128xf32>
    %65 = arith.maximumf %63, %64 : vector<1x128xf32>
    %66 = vector.broadcast %59 : vector<1x128xf32> to vector<16x128xf32>
    %67 = arith.subf %52, %66 : vector<16x128xf32>
    %cst_22 = arith.constant 1.000000e-03 : f32
    %68 = vector.broadcast %cst_22 : f32 to vector<1x128xf32>
    %69 = arith.addf %65, %68 : vector<1x128xf32>
    %70 = math.rsqrt %69 : vector<1x128xf32>
    %71 = arith.mulf %70, %43 : vector<1x128xf32>
    %72 = vector.broadcast %71 : vector<1x128xf32> to vector<16x128xf32>
    %73 = arith.mulf %67, %72 : vector<16x128xf32>
    %74 = vector.broadcast %44 : vector<1x128xf32> to vector<16x128xf32>
    %75 = arith.addf %73, %74 : vector<16x128xf32>
    %76 = vector.extract_strided_slice %75 {offsets = [0, 0], sizes = [16, 32], strides = [1, 1]} : vector<16x128xf32> to vector<16x32xf32>
    %c2 = arith.constant 2 : index
    %c0_23 = arith.constant 0 : index
    %c0_24 = arith.constant 0 : index
    %77 = vector.load %arg1[%c2, %c0_23, %c0_24] : memref<4x40x128xf32, #tpu.memory_space<vmem>>, vector<1x40x128xf32>
    %78 = vector.shape_cast %77 : vector<1x40x128xf32> to vector<40x128xf32>
    %79 = vector.extract_strided_slice %78 {offsets = [0, 0], sizes = [32, 128], strides = [1, 1]} : vector<40x128xf32> to vector<32x128xf32>
    %80 = vector.extract_strided_slice %78 {offsets = [32, 0], sizes = [1, 128], strides = [1, 1]} : vector<40x128xf32> to vector<1x128xf32>
    %81 = vector.extract_strided_slice %78 {offsets = [33, 0], sizes = [1, 128], strides = [1, 1]} : vector<40x128xf32> to vector<1x128xf32>
    %82 = vector.extract_strided_slice %78 {offsets = [34, 0], sizes = [1, 128], strides = [1, 1]} : vector<40x128xf32> to vector<1x128xf32>
    %cst_25 = arith.constant dense<0.000000e+00> : vector<16x128xf32>
    %83 = tpu.matmul %76, %79, %cst_25 {dimension_numbers = #tpu.dot_dimension_numbers<[1], [0], [0], [1], [0, 0, 1, 1], [], []>} : vector<16x32xf32>, vector<32x128xf32>, vector<16x128xf32> -> vector<16x128xf32>
    %84 = vector.broadcast %80 : vector<1x128xf32> to vector<16x128xf32>
    %85 = arith.addf %83, %84 : vector<16x128xf32>
    %cst_26 = arith.constant 0.000000e+00 : f32
    %86 = vector.broadcast %cst_26 : f32 to vector<16x128xf32>
    %87 = arith.cmpf oge, %85, %86 : vector<16x128xf32>
    %cst_27 = arith.constant 1.000000e-01 : f32
    %88 = vector.broadcast %cst_27 : f32 to vector<16x128xf32>
    %89 = arith.mulf %88, %85 : vector<16x128xf32>
    %90 = arith.select %87, %85, %89 : vector<16x128xi1>, vector<16x128xf32>
    %cst_28 = arith.constant dense<0.000000e+00> : vector<128xf32>
    %91 = vector.multi_reduction <add>, %90, %cst_28 [0] : vector<16x128xf32> to vector<128xf32>
    %92 = vector.shape_cast %91 : vector<128xf32> to vector<1x128xf32>
    %93 = arith.mulf %90, %90 : vector<16x128xf32>
    %cst_29 = arith.constant dense<0.000000e+00> : vector<128xf32>
    %94 = vector.multi_reduction <add>, %93, %cst_29 [0] : vector<16x128xf32> to vector<128xf32>
    %95 = vector.shape_cast %94 : vector<128xf32> to vector<1x128xf32>
    %cst_30 = arith.constant 6.250000e-02 : f32
    %96 = vector.broadcast %cst_30 : f32 to vector<1x128xf32>
    %97 = arith.mulf %92, %96 : vector<1x128xf32>
    %cst_31 = arith.constant 6.250000e-02 : f32
    %98 = vector.broadcast %cst_31 : f32 to vector<1x128xf32>
    %99 = arith.mulf %95, %98 : vector<1x128xf32>
    %100 = arith.mulf %97, %97 : vector<1x128xf32>
    %101 = arith.subf %99, %100 : vector<1x128xf32>
    %cst_32 = arith.constant 0.000000e+00 : f32
    %102 = vector.broadcast %cst_32 : f32 to vector<1x128xf32>
    %103 = arith.maximumf %101, %102 : vector<1x128xf32>
    %104 = vector.broadcast %97 : vector<1x128xf32> to vector<16x128xf32>
    %105 = arith.subf %90, %104 : vector<16x128xf32>
    %cst_33 = arith.constant 1.000000e-03 : f32
    %106 = vector.broadcast %cst_33 : f32 to vector<1x128xf32>
    %107 = arith.addf %103, %106 : vector<1x128xf32>
    %108 = math.rsqrt %107 : vector<1x128xf32>
    %109 = arith.mulf %108, %81 : vector<1x128xf32>
    %110 = vector.broadcast %109 : vector<1x128xf32> to vector<16x128xf32>
    %111 = arith.mulf %105, %110 : vector<16x128xf32>
    %112 = vector.broadcast %82 : vector<1x128xf32> to vector<16x128xf32>
    %113 = arith.addf %111, %112 : vector<16x128xf32>
    %114 = vector.extract_strided_slice %113 {offsets = [0, 0], sizes = [16, 32], strides = [1, 1]} : vector<16x128xf32> to vector<16x32xf32>
    %c3 = arith.constant 3 : index
    %c0_34 = arith.constant 0 : index
    %c0_35 = arith.constant 0 : index
    %115 = vector.load %arg1[%c3, %c0_34, %c0_35] : memref<4x40x128xf32, #tpu.memory_space<vmem>>, vector<1x40x128xf32>
    %116 = vector.shape_cast %115 : vector<1x40x128xf32> to vector<40x128xf32>
    %117 = vector.extract_strided_slice %116 {offsets = [0, 0], sizes = [32, 128], strides = [1, 1]} : vector<40x128xf32> to vector<32x128xf32>
    %118 = vector.extract_strided_slice %116 {offsets = [32, 0], sizes = [1, 128], strides = [1, 1]} : vector<40x128xf32> to vector<1x128xf32>
    %119 = vector.extract_strided_slice %116 {offsets = [33, 0], sizes = [1, 128], strides = [1, 1]} : vector<40x128xf32> to vector<1x128xf32>
    %120 = vector.extract_strided_slice %116 {offsets = [34, 0], sizes = [1, 128], strides = [1, 1]} : vector<40x128xf32> to vector<1x128xf32>
    %cst_36 = arith.constant dense<0.000000e+00> : vector<16x128xf32>
    %121 = tpu.matmul %114, %117, %cst_36 {dimension_numbers = #tpu.dot_dimension_numbers<[1], [0], [0], [1], [0, 0, 1, 1], [], []>} : vector<16x32xf32>, vector<32x128xf32>, vector<16x128xf32> -> vector<16x128xf32>
    %122 = vector.broadcast %118 : vector<1x128xf32> to vector<16x128xf32>
    %123 = arith.addf %121, %122 : vector<16x128xf32>
    %cst_37 = arith.constant 0.000000e+00 : f32
    %124 = vector.broadcast %cst_37 : f32 to vector<16x128xf32>
    %125 = arith.cmpf oge, %123, %124 : vector<16x128xf32>
    %cst_38 = arith.constant 1.000000e-01 : f32
    %126 = vector.broadcast %cst_38 : f32 to vector<16x128xf32>
    %127 = arith.mulf %126, %123 : vector<16x128xf32>
    %128 = arith.select %125, %123, %127 : vector<16x128xi1>, vector<16x128xf32>
    %cst_39 = arith.constant dense<0.000000e+00> : vector<128xf32>
    %129 = vector.multi_reduction <add>, %128, %cst_39 [0] : vector<16x128xf32> to vector<128xf32>
    %130 = vector.shape_cast %129 : vector<128xf32> to vector<1x128xf32>
    %131 = arith.mulf %128, %128 : vector<16x128xf32>
    %cst_40 = arith.constant dense<0.000000e+00> : vector<128xf32>
    %132 = vector.multi_reduction <add>, %131, %cst_40 [0] : vector<16x128xf32> to vector<128xf32>
    %133 = vector.shape_cast %132 : vector<128xf32> to vector<1x128xf32>
    %cst_41 = arith.constant 6.250000e-02 : f32
    %134 = vector.broadcast %cst_41 : f32 to vector<1x128xf32>
    %135 = arith.mulf %130, %134 : vector<1x128xf32>
    %cst_42 = arith.constant 6.250000e-02 : f32
    %136 = vector.broadcast %cst_42 : f32 to vector<1x128xf32>
    %137 = arith.mulf %133, %136 : vector<1x128xf32>
    %138 = arith.mulf %135, %135 : vector<1x128xf32>
    %139 = arith.subf %137, %138 : vector<1x128xf32>
    %cst_43 = arith.constant 0.000000e+00 : f32
    %140 = vector.broadcast %cst_43 : f32 to vector<1x128xf32>
    %141 = arith.maximumf %139, %140 : vector<1x128xf32>
    %142 = vector.broadcast %135 : vector<1x128xf32> to vector<16x128xf32>
    %143 = arith.subf %128, %142 : vector<16x128xf32>
    %cst_44 = arith.constant 1.000000e-03 : f32
    %144 = vector.broadcast %cst_44 : f32 to vector<1x128xf32>
    %145 = arith.addf %141, %144 : vector<1x128xf32>
    %146 = math.rsqrt %145 : vector<1x128xf32>
    %147 = arith.mulf %146, %119 : vector<1x128xf32>
    %148 = vector.broadcast %147 : vector<1x128xf32> to vector<16x128xf32>
    %149 = arith.mulf %143, %148 : vector<16x128xf32>
    %150 = vector.broadcast %120 : vector<1x128xf32> to vector<16x128xf32>
    %151 = arith.addf %149, %150 : vector<16x128xf32>
    %152 = vector.extract_strided_slice %151 {offsets = [0, 0], sizes = [16, 8], strides = [1, 1]} : vector<16x128xf32> to vector<16x8xf32>
    %c0_45 = arith.constant 0 : index
    %c0_46 = arith.constant 0 : index
    %153 = vector.load %arg2[%c0_45, %c0_46] : memref<16x8xf32, #tpu.memory_space<vmem>>, vector<16x8xf32>
    tpu.vector_store %arg2[%c0_45, %c0_46], %152 {strides = array<i32>} : memref<16x8xf32, #tpu.memory_space<vmem>>, vector<16x8xf32>,
    return
  }
}

</mosaic_0001>

<bundles_post_ra>
// kernel: simplenet_forward.1
= control target key start
LH: loop header
LB: loop body
LE: loop exit
PB: predicated region body
PF: predicated region fallthrough
CT: control target
= control target key end

     0   :  { %7 = vsyncpa [#allocation3], 0  ;;  %s833_s0 = inlined_call_operand.hbm [shape: f32[16,32], index: 0, kind: input, shape index: {}]   ;;  %s834_s1 = inlined_call_operand.hbm [shape: f32[4,40,128], index: 1, kind: input, shape index: {}]   ;;  %s835_s2 = inlined_call_operand.vmem [shape: f32[16,8], index: 2, kind: output, shape index: {}]  }
   0x1   :  { %8 = vsyncpa [#allocation5], 0  ;;  %s758_s9 = smov [#allocation2]   ;;  %s710_s13 = scalar_lea.hbm %s833_s0, 256 }
   0x2   :  { %s14_s10 = sshll.u32 %s758_s9, 4  ;;  %p711_p0 = scmp.ne.s32.totalorder %s833_s0, %s710_s13  ;;  %s15_s10 = int_to_ptr.vmem [resolvable:$true] %s14_s10 }
   0x3   :  { %p714_p1 = scmp.lt.u32.totalorder %s710_s13, %s833_s0 }
   0x5   :  { %p716_p2 = pnand %p714_p1, %p711_p0 }
   0x7   :  { %719 = shalt.err (!%p716_p2)
}
   0x8   :  { %s720_s18 = scalar_lea.vmem %s15_s10, 256  ;;  %p725_p4 = scmp.lt.s32.totalorder %s15_s10, %s15_s10 }
   0x9   :  { %p721_p3 = scmp.ne.s32.totalorder %s15_s10, %s720_s18  ;;  %p726_p5 = scmp.lt.s32.totalorder %s720_s18, %s720_s18 }
   0xb   :  { %p727_p6 = por %p726_p5, %p725_p4 }
   0xd   :  { %p728_p7 = pnand %p727_p6, %p721_p3 }
   0xf   :  { %731 = shalt.err (!%p728_p7)
}
  0x10   :  { %s759_s19 = smov 128   ;;  %s760_s20 = smov 8  }
  0x11   :  { %20 = dma.hbm_to_vmem [thread:$0]  %s833_s0, 256, %s15_s10, [#allocation3], %s759_s19, %s759_s19, %s760_s20  }
  0x12   :  { %s761_s23 = smov [#allocation4]   ;;  %s732_s27 = scalar_lea.hbm %s834_s1, 2560 }
  0x13   :  { %s26_s24 = sshll.u32 %s761_s23, 4  ;;  %p733_p8 = scmp.ne.s32.totalorder %s834_s1, %s732_s27  ;;  %s27_s24 = int_to_ptr.vmem [resolvable:$true] %s26_s24 }
  0x14   :  { %p736_p9 = scmp.lt.u32.totalorder %s732_s27, %s834_s1 }
  0x16   :  { %p738_p10 = pnand %p736_p9, %p733_p8 }
  0x18   :  { %741 = shalt.err (!%p738_p10)
}
  0x19   :  { %s742_s4 = scalar_lea.vmem %s27_s24, 2560  ;;  %p747_p12 = scmp.lt.s32.totalorder %s27_s24, %s27_s24 }
  0x1a   :  { %p743_p11 = scmp.ne.s32.totalorder %s27_s24, %s742_s4  ;;  %p748_p13 = scmp.lt.s32.totalorder %s742_s4, %s742_s4 }
  0x1c   :  { %p749_p0 = por %p748_p13, %p747_p12 }
  0x1e   :  { %p750_p1 = pnand %p749_p0, %p743_p11 }
  0x20   :  { %753 = shalt.err (!%p750_p1)
}
  0x21   :  { %32 = dma.hbm_to_vmem [thread:$0]  %s834_s1, 2560, %s27_s24, [#allocation5], %s759_s19, %s759_s19, %s760_s20  }
  0x22   :  { %754 = dma.done.wait [#allocation3], 256  }
  0x23   :  { %755 = vsyncadd [#allocation3], 4294967040 }
  0x24   :  { %756 = dma.done.wait [#allocation5], 2560  }
  0x25   :  { %757 = vsyncadd [#allocation5], 4294964736  ;;  %vm50_vm0 = vcmask 261120   ;;  %v41_v0 = vld [vmem:[#allocation4] sm:$0xff]  ;;  %v42_v1 = vld [vmem:[#allocation4 + $0x8] sm:$0xff]  ;;  %v46_v14 = vlaneseq  ;;  %vm581_vm9 = vcmask 64512  }
  0x26   :  { %v43_v2 = vld [vmem:[#allocation4 + $0x10] sm:$0xff]  ;;  %v666_v3 = vpack.c.bf16 %v42_v1, %v41_v0  ;;  %v44_v4 = vld [vmem:[#allocation4 + $0x18] sm:$0xff]  ;;  %v177_v8 = vld [vmem:[#allocation4 + $0x28] sm:$0xff] }
  0x27   :  { %v39_v5 = vld [vmem:[#allocation2] sm:$0xff]  ;;  %v670_v6 = vpack.c.bf16 %v44_v4, %v43_v2  ;;  %v40_v7 = vld [vmem:[#allocation2 + $0x8] sm:$0xff]  ;;  %v180_v12 = vld [vmem:[#allocation4 + $0x40] sm:$0xff]  ;;  %v47_v15 = vshrl.u32 %v46_v14, 7 }
  0x28   :  { %630 = vmatprep.mubr.msk.f32.mxu0 %vm50_vm0, %v39_v5  ;;  %667 = vmatprep.subr.bf16.mxu0 %v666_v3  ;;  %v178_v9 = vld [vmem:[#allocation4 + $0x30] sm:$0xff]  ;;  %v179_v10 = vld [vmem:[#allocation4 + $0x38] sm:$0xff]  ;;  %v45_v17 = vld [vmem:[#allocation4 + $0x20] sm:$0xff] }
  0x29   :  { %669 = vmatpush3.bf16.msra.mxu0 %v666_v3  ;;  %v674_v11 = vpack.c.bf16 %v178_v9, %v177_v8  ;;  %v678_v13 = vpack.c.bf16 %v180_v12, %v179_v10  ;;  %v803_v16 = vsub.s32 0, %v47_v15  ;;  %v806_v51 = vsub.s32 1, %v47_v15  ;;  %v312_v61 = vld [vmem:[#allocation4 + $0x50] sm:$0xff]  ;;  %v313_v62 = vld [vmem:[#allocation4 + $0x58] sm:$0xff]  ;;  %v314_v0 = vld [vmem:[#allocation4 + $0x60] sm:$0xff] }
  0x2a   :  { %671 = vmatprep.subr.bf16.mxu0 %v670_v6  ;;  %v808_v52 = vsub.s32 2, %v47_v15  ;;  %v682_v63 = vpack.c.bf16 %v313_v62, %v312_v61  ;;  %v315_v1 = vld [vmem:[#allocation4 + $0x68] sm:$0xff] }
  0x2b   :  { %675 = vmatprep.subr.bf16.mxu1 %v674_v11  ;;  %v49_v18 = vrot.slane %v45_v17, %v803_v16  ;;  %v686_v2 = vpack.c.bf16 %v315_v1, %v314_v0  ;;  %v181_v3 = vld [vmem:[#allocation4 + $0x48] sm:$0xff] }
  0x2c   :  { %677 = vmatpush3.bf16.msra.mxu1 %v674_v11  ;;  %v173_v56 = vrot.slane %v45_v17, %v808_v52  ;;  %v185_v4 = vrot.slane %v181_v3, %v803_v16 }
  0x2d   :  { %673 = vmatpush3.bf16.msra.mxu0 %v670_v6  ;;  %679 = vmatprep.subr.bf16.mxu1 %v678_v13 }
  0x2e   :  { %683 = vmatprep.subr.bf16.mxu0 %v682_v63 }
  0x30   :  { %631 = vmatmul.mubr.msk.f32.vlgmr.msra.gmra.mrb[0].mxu0 %vm50_vm0, %v40_v7  ;;  %681 = vmatpush3.bf16.msra.mxu1 %v678_v13 }
  0x31   :  { %685 = vmatpush3.bf16.msra.mxu0 %v682_v63 }
  0x32   :  { %687 = vmatprep.subr.bf16.mxu0 %v686_v2 }
  0x35   :  { %689 = vmatpush3.bf16.msra.mxu0 %v686_v2 }
 0x103   :  { %v632_v19 = vpop.f32.mrb[0].mxu0 }
 0x104   :  { %v129_v20 = vadd.f32 %v632_v19, %v49_v18  ;;  %v123_v21 = vpop.f32.mrb[1].mxu0 }
 0x105   :  { %v124_v22 = vadd.f32 %v123_v21, %v49_v18 }
 0x106   :  { %vm133_vm1 = vcmp.ge.f32.partialorder %v129_v20, 0.0  ;;  %v135_v23 = vmul.f32 0.1, %v129_v20 }
 0x107   :  { %vm132_vm2 = vcmp.ge.f32.partialorder %v124_v22, 0.0  ;;  %v134_v24 = vmul.f32 0.1, %v124_v22 }
 0x108   :  { %v137_v25 = vsel %vm133_vm1, %v129_v20, %v135_v23 }
 0x109   :  { %v146_v26 = vmul.f32 %v137_v25, %v137_v25  ;;  %v136_v27 = vsel %vm132_vm2, %v124_v22, %v134_v24 }
 0x10a   :  { %v138_v28 = vadd.f32 %v137_v25, %v136_v27  ;;  %v145_v29 = vmul.f32 %v136_v27, %v136_v27 }
 0x10c   :  { %v139_v30 = vrot.slane %v138_v28, 4  ;;  %v147_v31 = vadd.f32 %v146_v26, %v145_v29 }
 0x10e   :  { %v140_v32 = vadd.f32 %v139_v30, %v138_v28  ;;  %v148_v33 = vrot.slane %v147_v31, 4 }
 0x110   :  { %v141_v34 = vrot.slane %v140_v32, 2  ;;  %v149_v35 = vadd.f32 %v148_v33, %v147_v31 }
 0x112   :  { %v142_v36 = vadd.f32 %v141_v34, %v140_v32  ;;  %v150_v37 = vrot.slane %v149_v35, 2 }
 0x114   :  { %v151_v38 = vadd.f32 %v150_v37, %v149_v35  ;;  %v143_v39 = vrot.slane %v142_v36, 1 }
 0x116   :  { %v152_v40 = vrot.slane %v151_v38, 1  ;;  %v144_v41 = vadd.f32 %v143_v39, %v142_v36 }
 0x118   :  { %v153_v42 = vadd.f32 %v152_v40, %v151_v38  ;;  %v154_v43 = vmul.f32 0.0625, %v144_v41  ;;  %v308_v40 = vrot.slane %v181_v3, %v808_v52 }
 0x11a   :  { %v155_v44 = vmul.f32 0.0625, %v153_v42  ;;  %v156_v45 = vmul.f32 %v154_v43, %v154_v43  ;;  %v159_v46 = vsub.f32 %v136_v27, %v154_v43  ;;  %v160_v47 = vsub.f32 %v137_v25, %v154_v43 }
 0x11c   :  { %v157_v48 = vsub.f32 %v155_v44, %v156_v45 }
 0x11e   :  { %v158_v49 = vmax.f32 %v157_v48, 0.0 }
 0x120   :  { %v161_v50 = vadd.f32 0.001, %v158_v49  ;;  %v449_v49 = vld [vmem:[#allocation4 + $0x88] sm:$0xff] }
 0x122   :  { %702 = vrsqrt.f32 %v161_v50  ;;  %v450_v50 = vld [vmem:[#allocation4 + $0x90] sm:$0xff] }
 0x12c   :  { %v703_v53 = vpop.eup %702 }
 0x12d   :  { %v163_v54 = vmul.f32 %v703_v53, %v45_v17  ;;  %v694_v53 = vpack.c.bf16 %v450_v50, %v449_v49 }
 0x12f   :  { %v167_v55 = vrot.slane %v163_v54, %v806_v51  ;;  %v316_v54 = vld [vmem:[#allocation4 + $0x70] sm:$0xff] }
 0x131   :  { %v168_v57 = vmul.f32 %v167_v55, %v159_v46  ;;  %v169_v58 = vmul.f32 %v167_v55, %v160_v47  ;;  %v447_v46 = vld [vmem:[#allocation4 + $0x78] sm:$0xff]  ;;  %v448_v47 = vld [vmem:[#allocation4 + $0x80] sm:$0xff]  ;;  %v320_v55 = vrot.slane %v316_v54, %v803_v16 }
 0x132   :  { %v690_v48 = vpack.c.bf16 %v448_v47, %v447_v46 }
 0x133   :  { %v174_v59 = vadd.f32 %v173_v56, %v168_v57  ;;  %v175_v60 = vadd.f32 %v173_v56, %v169_v58 }
 0x134   :  { %691 = vmatprep.subr.bf16.mxu1 %v690_v48 }
 0x135   :  { %641 = vmatprep.mubr.msk.f32.mxu1 %vm50_vm0, %v174_v59 }
 0x136   :  { %642 = vmatmul.mubr.msk.f32.vlgmr.msra.gmra.mrb[0].mxu1 %vm50_vm0, %v175_v60 }
 0x137   :  { %693 = vmatpush3.bf16.msra.mxu1 %v690_v48 }
 0x138   :  { %695 = vmatprep.subr.bf16.mxu1 %v694_v53 }
 0x13b   :  { %697 = vmatpush3.bf16.msra.mxu1 %v694_v53 }
 0x209   :  { %v643_v5 = vpop.f32.mrb[0].mxu1 }
 0x20a   :  { %v264_v6 = vadd.f32 %v643_v5, %v185_v4  ;;  %v258_v7 = vpop.f32.mrb[1].mxu1 }
 0x20b   :  { %v259_v8 = vadd.f32 %v258_v7, %v185_v4 }
 0x20c   :  { %vm268_vm3 = vcmp.ge.f32.partialorder %v264_v6, 0.0  ;;  %v270_v9 = vmul.f32 0.1, %v264_v6 }
 0x20d   :  { %vm267_vm4 = vcmp.ge.f32.partialorder %v259_v8, 0.0  ;;  %v269_v10 = vmul.f32 0.1, %v259_v8 }
 0x20e   :  { %v272_v11 = vsel %vm268_vm3, %v264_v6, %v270_v9 }
 0x20f   :  { %v281_v12 = vmul.f32 %v272_v11, %v272_v11  ;;  %v271_v13 = vsel %vm267_vm4, %v259_v8, %v269_v10 }
 0x210   :  { %v273_v14 = vadd.f32 %v272_v11, %v271_v13  ;;  %v280_v15 = vmul.f32 %v271_v13, %v271_v13 }
 0x212   :  { %v274_v17 = vrot.slane %v273_v14, 4  ;;  %v282_v18 = vadd.f32 %v281_v12, %v280_v15 }
 0x214   :  { %v275_v19 = vadd.f32 %v274_v17, %v273_v14  ;;  %v283_v20 = vrot.slane %v282_v18, 4 }
 0x216   :  { %v276_v21 = vrot.slane %v275_v19, 2  ;;  %v284_v22 = vadd.f32 %v283_v20, %v282_v18 }
 0x218   :  { %v277_v23 = vadd.f32 %v276_v21, %v275_v19  ;;  %v285_v24 = vrot.slane %v284_v22, 2 }
 0x21a   :  { %v278_v25 = vrot.slane %v277_v23, 1  ;;  %v286_v26 = vadd.f32 %v285_v24, %v284_v22 }
 0x21c   :  { %v279_v27 = vadd.f32 %v278_v25, %v277_v23  ;;  %v287_v28 = vrot.slane %v286_v26, 1 }
 0x21e   :  { %v288_v29 = vadd.f32 %v287_v28, %v286_v26  ;;  %v289_v30 = vmul.f32 0.0625, %v279_v27  ;;  %v443_v27 = vrot.slane %v316_v54, %v808_v52 }
 0x220   :  { %v290_v31 = vmul.f32 0.0625, %v288_v29  ;;  %v291_v32 = vmul.f32 %v289_v30, %v289_v30  ;;  %v294_v33 = vsub.f32 %v271_v13, %v289_v30  ;;  %v295_v34 = vsub.f32 %v272_v11, %v289_v30 }
 0x222   :  { %v292_v35 = vsub.f32 %v290_v31, %v291_v32 }
 0x224   :  { %v293_v36 = vmax.f32 %v292_v35, 0.0 }
 0x226   :  { %v296_v37 = vadd.f32 0.001, %v293_v36 }
 0x228   :  { %704 = vrsqrt.f32 %v296_v37 }
 0x232   :  { %v705_v38 = vpop.eup %704 }
 0x233   :  { %v298_v39 = vmul.f32 %v705_v38, %v181_v3 }
 0x235   :  { %v302_v41 = vrot.slane %v298_v39, %v806_v51 }
 0x237   :  { %v303_v42 = vmul.f32 %v302_v41, %v294_v33  ;;  %v304_v43 = vmul.f32 %v302_v41, %v295_v34  ;;  %v451_v33 = vld [vmem:[#allocation4 + $0x98] sm:$0xff] }
 0x238   :  { %v455_v34 = vrot.slane %v451_v33, %v803_v16 }
 0x239   :  { %v309_v44 = vadd.f32 %v308_v40, %v303_v42  ;;  %v310_v45 = vadd.f32 %v308_v40, %v304_v43 }
 0x23b   :  { %652 = vmatprep.mubr.msk.f32.mxu0 %vm50_vm0, %v309_v44 }
 0x23c   :  { %653 = vmatmul.mubr.msk.f32.vlgmr.msra.gmra.mrb[2].mxu0 %vm50_vm0, %v310_v45 }
 0x30f   :  { %v654_v56 = vpop.f32.mrb[2].mxu0 }
 0x310   :  { %v399_v57 = vadd.f32 %v654_v56, %v320_v55  ;;  %v393_v58 = vpop.f32.mrb[3].mxu0 }
 0x311   :  { %v394_v59 = vadd.f32 %v393_v58, %v320_v55 }
 0x312   :  { %vm403_vm5 = vcmp.ge.f32.partialorder %v399_v57, 0.0  ;;  %v405_v60 = vmul.f32 0.1, %v399_v57 }
 0x313   :  { %vm402_vm6 = vcmp.ge.f32.partialorder %v394_v59, 0.0  ;;  %v404_v61 = vmul.f32 0.1, %v394_v59 }
 0x314   :  { %v407_v62 = vsel %vm403_vm5, %v399_v57, %v405_v60 }
 0x315   :  { %v416_v63 = vmul.f32 %v407_v62, %v407_v62  ;;  %v406_v0 = vsel %vm402_vm6, %v394_v59, %v404_v61 }
 0x316   :  { %v408_v1 = vadd.f32 %v407_v62, %v406_v0  ;;  %v415_v2 = vmul.f32 %v406_v0, %v406_v0 }
 0x318   :  { %v409_v3 = vrot.slane %v408_v1, 4  ;;  %v417_v4 = vadd.f32 %v416_v63, %v415_v2 }
 0x31a   :  { %v410_v5 = vadd.f32 %v409_v3, %v408_v1  ;;  %v418_v6 = vrot.slane %v417_v4, 4 }
 0x31c   :  { %v411_v7 = vrot.slane %v410_v5, 2  ;;  %v419_v8 = vadd.f32 %v418_v6, %v417_v4  ;;  %v578_v6 = vrot.slane %v451_v33, %v808_v52 }
 0x31e   :  { %v412_v9 = vadd.f32 %v411_v7, %v410_v5  ;;  %v420_v10 = vrot.slane %v419_v8, 2 }
 0x320   :  { %v413_v11 = vrot.slane %v412_v9, 1  ;;  %v421_v12 = vadd.f32 %v420_v10, %v419_v8 }
 0x322   :  { %v414_v13 = vadd.f32 %v413_v11, %v412_v9  ;;  %v422_v14 = vrot.slane %v421_v12, 1 }
 0x324   :  { %v423_v15 = vadd.f32 %v422_v14, %v421_v12  ;;  %v424_v17 = vmul.f32 0.0625, %v414_v13 }
 0x326   :  { %v425_v18 = vmul.f32 0.0625, %v423_v15  ;;  %v426_v19 = vmul.f32 %v424_v17, %v424_v17  ;;  %v429_v20 = vsub.f32 %v406_v0, %v424_v17  ;;  %v430_v21 = vsub.f32 %v407_v62, %v424_v17 }
 0x328   :  { %v427_v22 = vsub.f32 %v425_v18, %v426_v19 }
 0x32a   :  { %v428_v23 = vmax.f32 %v427_v22, 0.0 }
 0x32c   :  { %v431_v24 = vadd.f32 0.001, %v428_v23 }
 0x32e   :  { %706 = vrsqrt.f32 %v431_v24 }
 0x338   :  { %v707_v25 = vpop.eup %706 }
 0x339   :  { %v433_v26 = vmul.f32 %v707_v25, %v316_v54 }
 0x33b   :  { %v437_v28 = vrot.slane %v433_v26, %v806_v51 }
 0x33d   :  { %v438_v29 = vmul.f32 %v437_v28, %v429_v20  ;;  %v439_v30 = vmul.f32 %v437_v28, %v430_v21 }
 0x33f   :  { %v444_v31 = vadd.f32 %v443_v27, %v438_v29  ;;  %v445_v32 = vadd.f32 %v443_v27, %v439_v30 }
 0x341   :  { %663 = vmatprep.mubr.msk.f32.mxu1 %vm50_vm0, %v444_v31 }
 0x342   :  { %664 = vmatmul.mubr.msk.f32.vlgmr.msra.gmra.mrb[2].mxu1 %vm50_vm0, %v445_v32 }
 0x415   :  { %v665_v35 = vpop.f32.mrb[2].mxu1 }
 0x416   :  { %v534_v36 = vadd.f32 %v665_v35, %v455_v34  ;;  %v528_v37 = vpop.f32.mrb[3].mxu1 }
 0x417   :  { %v529_v38 = vadd.f32 %v528_v37, %v455_v34 }
 0x418   :  { %vm538_vm7 = vcmp.ge.f32.partialorder %v534_v36, 0.0  ;;  %v540_v39 = vmul.f32 0.1, %v534_v36 }
 0x419   :  { %vm537_vm8 = vcmp.ge.f32.partialorder %v529_v38, 0.0  ;;  %v539_v40 = vmul.f32 0.1, %v529_v38 }
 0x41a   :  { %v542_v41 = vsel %vm538_vm7, %v534_v36, %v540_v39 }
 0x41b   :  { %v551_v42 = vmul.f32 %v542_v41, %v542_v41  ;;  %v541_v43 = vsel %vm537_vm8, %v529_v38, %v539_v40 }
 0x41c   :  { %v543_v44 = vadd.f32 %v542_v41, %v541_v43  ;;  %v550_v45 = vmul.f32 %v541_v43, %v541_v43 }
 0x41e   :  { %v544_v46 = vrot.slane %v543_v44, 4  ;;  %v552_v47 = vadd.f32 %v551_v42, %v550_v45 }
 0x420   :  { %v545_v48 = vadd.f32 %v544_v46, %v543_v44  ;;  %v553_v49 = vrot.slane %v552_v47, 4 }
 0x422   :  { %v546_v50 = vrot.slane %v545_v48, 2  ;;  %v554_v53 = vadd.f32 %v553_v49, %v552_v47 }
 0x424   :  { %v547_v16 = vadd.f32 %v546_v50, %v545_v48  ;;  %v555_v54 = vrot.slane %v554_v53, 2 }
 0x426   :  { %v548_v55 = vrot.slane %v547_v16, 1  ;;  %v556_v56 = vadd.f32 %v555_v54, %v554_v53 }
 0x428   :  { %v549_v57 = vadd.f32 %v548_v55, %v547_v16  ;;  %v557_v58 = vrot.slane %v556_v56, 1 }
 0x42a   :  { %v558_v59 = vadd.f32 %v557_v58, %v556_v56  ;;  %v559_v60 = vmul.f32 0.0625, %v549_v57 }
 0x42c   :  { %v560_v61 = vmul.f32 0.0625, %v558_v59  ;;  %v561_v62 = vmul.f32 %v559_v60, %v559_v60  ;;  %v564_v63 = vsub.f32 %v541_v43, %v559_v60  ;;  %v565_v0 = vsub.f32 %v542_v41, %v559_v60 }
 0x42e   :  { %v562_v1 = vsub.f32 %v560_v61, %v561_v62 }
 0x430   :  { %v563_v2 = vmax.f32 %v562_v1, 0.0 }
 0x432   :  { %v566_v3 = vadd.f32 0.001, %v563_v2 }
 0x434   :  { %708 = vrsqrt.f32 %v566_v3 }
 0x43e   :  { %v709_v4 = vpop.eup %708 }
 0x43f   :  { %v568_v5 = vmul.f32 %v709_v4, %v451_v33 }
 0x441   :  { %v572_v7 = vrot.slane %v568_v5, %v806_v51 }
 0x443   :  { %v573_v8 = vmul.f32 %v572_v7, %v564_v63  ;;  %v574_v9 = vmul.f32 %v572_v7, %v565_v0 }
 0x445   :  { %v579_v10 = vadd.f32 %v578_v6, %v573_v8  ;;  %v580_v11 = vadd.f32 %v578_v6, %v574_v9 }
 0x447   :  { %582 = vst.msk [vmem:[%s835_s2] sm:$0xff] %vm581_vm9, %v579_v10  ;;  %583 = vst.msk [vmem:[%s835_s2 + $0x8] sm:$0xff] %vm581_vm9, %v580_v11 }
 0x448   :  { %588 = vsyncpa [#allocation3], 1 }
 0x449   :  { %589 = vsyncpa [#allocation5], 1 }

</bundles_post_ra>
